<compile_context>
chip_gen: v7x
topology: tpu7x:2x2x1
jax: 0.10.0
libtpu: 0.0.40
codegen_flags: <defaults>
</compile_context>

<pallas_src>
import jax
import jax.numpy as jnp
from jax.experimental import pallas as pl
from jax.experimental.pallas import tpu as pltpu

_LANES = 128
_TARGET_F32_BLOCK_BYTES = 2 * 1024 * 1024   # block sized off its f32 footprint
_MIN_BLOCKS = 8                              # fill/drain tail + v7x 2-TC balance
_RAGGED_BLOCK_ELEMS = 64 * 1024              # 1-D tail path (multiple of 32*128)


def _swish_kernel(x_ref, o_ref):
    # Compute in f32 regardless of storage dtype; cast back on store.
    x = x_ref[...].astype(jnp.float32)
    # Exact sigmoid via one tanh: 1 EUP transcendental / element instead of 2.
    sig = 0.5 * (jnp.tanh(0.5 * x) + 1.0)
    o_ref[...] = (x * sig).astype(o_ref.dtype)


def _round_down(v, m):
    return (v // m) * m


def _round_up(v, m):
    return -(-v // m) * m


def _swish_impl(x):
    orig_shape = x.shape
    dtype = x.dtype
    n = x.size
    if n == 0:
        return x

    itemsize = jnp.dtype(dtype).itemsize
    packing = max(1, 4 // itemsize)
    sub = 8 * packing                 # sublane rows per packed vreg tile
    x_flat = x.reshape(-1)            # layout-preserving under jit

    if n % _LANES == 0:
        # Fast path: dense (rows, 128) view -> perfect vreg mapping.
        rows = n // _LANES
        tile_rows = max(sub,
                        _round_down(_TARGET_F32_BLOCK_BYTES // 4 // _LANES, sub))
        if rows >= _MIN_BLOCKS * sub:
            # Keep >= _MIN_BLOCKS blocks when the tensor is big enough.
            cap = max(sub, _round_down(pl.cdiv(rows, _MIN_BLOCKS), sub))
            tile_rows = min(tile_rows, cap)
        tile_rows = min(tile_rows, rows)      # single full-array block if small
        block_elems = tile_rows * _LANES
        grid = (pl.cdiv(rows, tile_rows),)
        arr = x_flat.reshape(rows, _LANES)
        in_spec = pl.BlockSpec((tile_rows, _LANES), lambda i: (i, 0))
        out_spec = pl.BlockSpec((tile_rows, _LANES), lambda i: (i, 0))
        out_struct = jax.ShapeDtypeStruct((rows, _LANES), dtype)
        # Double-buffered in+out blocks plus ~6 block-sized f32 temporaries.
        vmem_limit = int(min(32 << 20,
                             max(16 << 20,
                                 4 * block_elems * itemsize
                                 + 6 * block_elems * 4 + (2 << 20))))
    else:
        # Ragged path (n % 128 != 0): 1-D stream; Pallas masks the partial
        # final block in-kernel, so no host-side pad/slice and no extra HBM
        # round trips.
        block_elems = min(_RAGGED_BLOCK_ELEMS, _round_up(n, sub * _LANES))
        grid = (pl.cdiv(n, block_elems),)
        arr = x_flat
        in_spec = pl.BlockSpec((block_elems,), lambda i: (i,))
        out_spec = pl.BlockSpec((block_elems,), lambda i: (i,))
        out_struct = jax.ShapeDtypeStruct((n,), dtype)
        vmem_limit = 32 << 20     # generous headroom for 1-D layout padding

    out = pl.pallas_call(
        _swish_kernel,
        out_shape=out_struct,
        grid=grid,
        in_specs=[in_spec],
        out_specs=out_spec,
        compiler_params=pltpu.CompilerParams(
            dimension_semantics=("parallel",),
            vmem_limit_bytes=vmem_limit,
        ),
        cost_estimate=pl.CostEstimate(
            flops=4 * n,
            transcendentals=n,                 # one tanh per element
            bytes_accessed=2 * n * itemsize,   # one read + one write of x
        ),
    )(arr)

    return out.reshape(orig_shape)


# Jit the wrapper so the flatten / reshape around the pallas_call stay layout
# bitcasts fused with the custom call instead of separately dispatched copies.
_swish_jit = jax.jit(_swish_impl)


def swish(x):
    """Elementwise swish (x * sigmoid(x)); matches torch Swish.forward."""
    return _swish_jit(x)


if __name__ == "__main__":
    key = jax.random.PRNGKey(0)

    # NCHW input consistent with conv-style usage in timesformer.
    x = jax.random.normal(key, (2, 4, 16, 16), dtype=jnp.float32)
    y = swish(x)
    jax.block_until_ready(y)
    ref = x * jax.nn.sigmoid(x)
    assert y.shape == x.shape and y.dtype == x.dtype
    assert jnp.allclose(y, ref, atol=1e-5, rtol=1e-5)

    # Ragged size (not a multiple of 128) exercises the in-kernel masked tail.
    x2 = jax.random.normal(jax.random.PRNGKey(1), (3, 5, 7), dtype=jnp.float32)
    y2 = swish(x2)
    jax.block_until_ready(y2)
    ref2 = x2 * jax.nn.sigmoid(x2)
    assert y2.shape == x2.shape and jnp.allclose(y2, ref2, atol=1e-5, rtol=1e-5)

    # bf16 stays bf16 end-to-end (halves HBM bytes for this mem-bound op).
    xb = jax.random.normal(jax.random.PRNGKey(2), (2, 4, 16, 16),
                           dtype=jnp.bfloat16)
    yb = swish(xb)
    jax.block_until_ready(yb)
    xbf = xb.astype(jnp.float32)
    refb = xbf * jax.nn.sigmoid(xbf)
    assert yb.dtype == jnp.bfloat16
    assert jnp.allclose(yb.astype(jnp.float32), refb, atol=2e-2, rtol=2e-2)

    print("KERNEL_OK")
</pallas_src>

<mosaic_0001>
module attributes {stable_mosaic.version = 11 : i64} {
  func.func @_swish_kernel(%arg0: i32, %arg1: memref<16x128xf32, #tpu.memory_space<vmem>>, %arg2: memref<16x128xf32, #tpu.memory_space<vmem>>) attributes {dimension_semantics = [#tpu.dimension_semantics<parallel>], iteration_bounds = array<i64: 1>, scalar_prefetch = 0 : i64, scratch_operands = 0 : i64, tpu.core_type = #tpu.core_type<tc>, window_params = [{transform_indices = @transform_0, window_bounds = array<i64: 16, 128>}, {transform_indices = @transform_1, window_bounds = array<i64: 16, 128>}]} {
    %c0 = arith.constant 0 : index
    %c0_0 = arith.constant 0 : index
    %0 = vector.load %arg1[%c0, %c0_0] : memref<16x128xf32, #tpu.memory_space<vmem>>, vector<16x128xf32>
    %cst = arith.constant 5.000000e-01 : f32
    %1 = vector.broadcast %cst : f32 to vector<16x128xf32>
    %2 = arith.mulf %1, %0 : vector<16x128xf32>
    %3 = math.tanh %2 : vector<16x128xf32>
    %cst_1 = arith.constant 1.000000e+00 : f32
    %4 = vector.broadcast %cst_1 : f32 to vector<16x128xf32>
    %5 = arith.addf %3, %4 : vector<16x128xf32>
    %cst_2 = arith.constant 5.000000e-01 : f32
    %6 = vector.broadcast %cst_2 : f32 to vector<16x128xf32>
    %7 = arith.mulf %6, %5 : vector<16x128xf32>
    %8 = arith.mulf %0, %7 : vector<16x128xf32>
    %c0_3 = arith.constant 0 : index
    %c0_4 = arith.constant 0 : index
    %9 = vector.load %arg2[%c0_3, %c0_4] : memref<16x128xf32, #tpu.memory_space<vmem>>, vector<16x128xf32>
    tpu.vector_store %arg2[%c0_3, %c0_4], %8 {strides = array<i32>} : memref<16x128xf32, #tpu.memory_space<vmem>>, vector<16x128xf32>,
    return
  }
  func.func @transform_0(%arg0: i32) -> (i32, i32) {
    %c0_i32 = arith.constant 0 : i32
    %c0_i32_0 = arith.constant 0 : i32
    return %arg0, %c0_i32 : i32, i32
  }
  func.func @transform_1(%arg0: i32) -> (i32, i32) {
    %c0_i32 = arith.constant 0 : i32
    %c0_i32_0 = arith.constant 0 : i32
    return %arg0, %c0_i32 : i32, i32
  }
}

</mosaic_0001>

<bundles_post_ra>
// kernel: _swish_impl.1
= control target key start
LH: loop header
LB: loop body
LE: loop exit
PB: predicated region body
PF: predicated region fallthrough
CT: control target
= control target key end

     0   :  { %s52_s0 = inlined_call_operand.vmem [shape: f32[16,128], index: 0, kind: input, shape index: {}]   ;;  %s53_s1 = inlined_call_operand.vmem [shape: f32[16,128], index: 1, kind: output, shape index: {}]  }
   0x1   :  { %v8_v0 = vld [vmem:[%s52_s0] sm:$0xff]  ;;  %v9_v1 = vld [vmem:[%s52_s0 + $0x8] sm:$0xff] }
   0x2   :  { %v10_v2 = vmul.f32 0.5, %v8_v0  ;;  %v11_v3 = vmul.f32 0.5, %v9_v1 }
   0x4   :  { %26 = vtanh.f32 %v10_v2 }
   0x5   :  { %28 = vtanh.f32 %v11_v3 }
   0xe   :  { %v27_v4 = vpop.eup %26 }
   0xf   :  { %v29_v5 = vpop.eup %28  ;;  %v14_v6 = vadd.f32 1.0, %v27_v4 }
  0x10   :  { %v15_v7 = vadd.f32 1.0, %v29_v5 }
  0x11   :  { %v16_v8 = vmul.f32 0.5, %v14_v6 }
  0x12   :  { %v17_v9 = vmul.f32 0.5, %v15_v7 }
  0x13   :  { %v18_v10 = vmul.f32 %v16_v8, %v8_v0 }
  0x14   :  { %v19_v11 = vmul.f32 %v17_v9, %v9_v1 }
  0x15   :  { %20 = vst [vmem:[%s53_s1] sm:$0xff] %v18_v10 }
  0x16   :  { %21 = vst [vmem:[%s53_s1 + $0x8] sm:$0xff] %v19_v11 }

</bundles_post_ra>
